<compile_context>
chip_gen: v6e
topology: v6e:2x2x1
jax: 0.10.0
libtpu: 0.0.40
codegen_flags: <defaults>
</compile_context>

<pallas_src>
from functools import partial

import jax
import jax.numpy as jnp
from jax.experimental import pallas as pl
from jax.experimental.pallas import tpu as pltpu


def _etl_kernel(x_ref, idx_ref, wq_ref, kb_ref, vb_ref, v_ref, seg_ref, out_ref):
    """Fused ETL attention for one batch tile.

    x_ref:   [tm, d_q]      query rows for this grid step
    idx_ref: [tm, 1] int32  hard token index per row
    wq_ref:  [d_q, E]       query projection
    kb_ref:  [E, h*T_k]     block-diagonal K' (1/sqrt(key_dim) folded in)
    vb_ref:  [h*T_k, E]     block-diagonal V' (head-merge happens in the matmul)
    v_ref:   [T_k, E]       plain V (hard path: onehot @ V == concat_h gather)
    seg_ref: [h*T_k, h*T_k] block-diagonal ones (segmented softmax sums)
    out_ref: [tm, 2E + h*T_k]  fused (out_hard | out_soft | scores) slab
    """
    x = x_ref[...]
    tm = x.shape[0]
    token_num = v_ref.shape[0]

    # Query projection + all-heads scores in two full-width MXU matmuls.
    q = jnp.dot(x, wq_ref[...], preferred_element_type=jnp.float32)        # [tm, E]
    s = jnp.dot(q, kb_ref[...], preferred_element_type=jnp.float32)        # [tm, h*T_k]

    # Segmented softmax over each token_num-lane group.  Row-global max is used
    # for stabilization: the per-row constant cancels exactly inside each group,
    # so the result is mathematically identical to per-group-max softmax while
    # avoiding any lane-splitting reshape.  Group sums via one MXU matmul with
    # the block-diagonal ones matrix; exact division (no approx reciprocal).
    m = jnp.max(s, axis=-1, keepdims=True)
    e = jnp.exp(s - m)
    denom = jnp.dot(e, seg_ref[...], preferred_element_type=jnp.float32)   # [tm, h*T_k]
    p = e / denom                                                          # softmax scores

    # Soft output: one matmul against block-diagonal V' == concat_h(p_h @ v_h).
    out_soft = jnp.dot(p, vb_ref[...], preferred_element_type=jnp.float32)  # [tm, E]

    # Hard output: in-kernel one-hot (iota == idx) then one small matmul.
    # Out-of-range indices give an all-zero row (matches jax.nn.one_hot).
    iota = jax.lax.broadcasted_iota(jnp.int32, (tm, token_num), 1)
    onehot = (iota == idx_ref[...]).astype(jnp.float32)                     # [tm, T_k]
    out_hard = jnp.dot(onehot, v_ref[...], preferred_element_type=jnp.float32)  # [tm, E]

    # Single fused store: (out_hard | out_soft | scores).
    out_ref[...] = jnp.concatenate([out_hard, out_soft, p], axis=-1)


def _pick_tile(N):
    """Batch tile: full batch when tiny; otherwise ~N/2 (multiple of 8, <=512).

    Keeping >=2 grid steps lets the 'parallel' axis shard across both v7x
    TensorCores; on v5e/v6e the extra step only costs ~0.35 us.  All blocks at
    these widths are a few hundred KB — far below any VMEM limit (v7x: 64 MiB
    physical / ~32 MiB default scoped).
    """
    if N <= 16:
        return N
    half = -(-N // 2)                     # cdiv(N, 2)
    return min(512, ((half + 7) // 8) * 8)


@partial(jax.jit, static_argnames=("num_heads",))
def etl_forward(inputs, score_hard_idx, params, *, num_heads):
    """JAX wrapper mirroring ETL.forward(inputs, score_hard)."""
    embed = params["embed"]   # [token_num, d_k]
    wq = params["wq"]         # [d_q, E]
    wk = params["wk"]         # [d_k, E]
    wv = params["wv"]         # [d_k, E]

    N, d_q = inputs.shape
    token_num, d_k = embed.shape
    E = wq.shape[1]
    split = E // num_heads
    HT = num_heads * token_num

    # ---- Batch-independent precompute hoisted out of the grid loop (XLA). ----
    keys_soft = jnp.tanh(embed)                                  # [T_k, d_k]
    k = keys_soft @ wk                                           # [T_k, E]
    v = keys_soft @ wv                                           # [T_k, E]

    scale = 1.0 / (d_k ** 0.5)                                   # key_dim = E // num_heads
    eye_h = jnp.eye(num_heads, dtype=jnp.float32)

    # Block-diagonal K': [E, h*T_k], K'[(h,s),(g,t)] = k[t, h*split+s] * (h==g).
    # q @ K' == concat_h(q_h @ k_h^T), lane-contiguous per head.  Scale folded in.
    k3 = k.reshape(token_num, num_heads, split)                  # [T, h, s]
    kb = (scale * jnp.einsum("ths,hg->hsgt", k3, eye_h)).reshape(E, HT)

    # Block-diagonal V': [h*T_k, E], V'[(h,t),(g,s)] = v[t, h*split+s] * (h==g).
    # p @ V' == concat_h(p_h @ v_h)  (merged-head soft output).
    v3 = v.reshape(token_num, num_heads, split)                  # [T, h, s]
    vb = jnp.einsum("ths,hg->htgs", v3, eye_h).reshape(HT, E)

    # Block-diagonal ones: segmented-sum spread matrix for the softmax denom.
    seg = jnp.arange(HT, dtype=jnp.int32) // token_num
    gmat = (seg[:, None] == seg[None, :]).astype(jnp.float32)    # [HT, HT]

    idx_col = score_hard_idx.astype(jnp.int32).reshape(N, 1)     # [N, 1]

    # ---- Pallas call over the batch. ----
    tm = _pick_tile(N)
    nb = pl.cdiv(N, tm)
    out_w = 2 * E + HT

    grid_spec = pltpu.PrefetchScalarGridSpec(
        num_scalar_prefetch=0,
        grid=(nb,),
        in_specs=[
            pl.BlockSpec((tm, d_q), lambda i: (i, 0)),           # inputs
            pl.BlockSpec((tm, 1), lambda i: (i, 0)),             # hard indices (column)
            pl.BlockSpec((d_q, E), lambda i: (0, 0)),            # wq
            pl.BlockSpec((E, HT), lambda i: (0, 0)),             # block-diag K' (scaled)
            pl.BlockSpec((HT, E), lambda i: (0, 0)),             # block-diag V'
            pl.BlockSpec((token_num, E), lambda i: (0, 0)),      # V (hard path)
            pl.BlockSpec((HT, HT), lambda i: (0, 0)),            # segment-sum matrix
        ],
        out_specs=pl.BlockSpec((tm, out_w), lambda i: (i, 0)),   # fused output slab
    )

    fused = pl.pallas_call(
        _etl_kernel,
        out_shape=jax.ShapeDtypeStruct((N, out_w), jnp.float32),
        grid_spec=grid_spec,
        compiler_params=pltpu.CompilerParams(
            dimension_semantics=("parallel",)),
    )(inputs, idx_col, wq, kb, vb, v, gmat)

    out_hard = fused[:, :E]                                      # [N, E]
    out_soft = fused[:, E:2 * E]                                 # [N, E]
    p_all = fused[:, 2 * E:]                                     # [N, h*T_k]

    # F.one_hot(...).float() — returned as the third output (glue only).
    onehot = jax.nn.one_hot(score_hard_idx, token_num, dtype=jnp.float32)  # [N, T_k]

    emotion_embed_hard = out_hard[:, None, :]                    # [N, 1, E]
    emotion_embed_soft = out_soft[:, None, :]                    # [N, 1, E]

    # Scores back to torch's stacked-head layout [h, N, 1, T_k].
    scores_soft = jnp.transpose(
        p_all.reshape(N, num_heads, token_num), (1, 0, 2))[:, :, None, :]

    # Reproduce torch's score_soft.squeeze(0).squeeze(1): only drops size-1 dims.
    ss = scores_soft
    if ss.shape[0] == 1:
        ss = jnp.squeeze(ss, axis=0)
    if ss.shape[1] == 1:
        ss = jnp.squeeze(ss, axis=1)

    return emotion_embed_hard, emotion_embed_soft, onehot, ss


def _etl_reference(inputs, score_hard_idx, params, *, num_heads):
    """Pure-JAX reference of the same math."""
    embed, wq, wk, wv = params["embed"], params["wq"], params["wk"], params["wv"]
    token_num, d_k = embed.shape

    keys_soft = jnp.tanh(embed)                                  # [T_k, d_k]
    q = inputs @ wq                                              # [N, E]
    k = keys_soft @ wk                                           # [T_k, E]
    v = keys_soft @ wv                                           # [T_k, E]
    onehot = jax.nn.one_hot(score_hard_idx, token_num, dtype=jnp.float32)

    qh = jnp.stack(jnp.split(q, num_heads, axis=1), axis=0)      # [h, N, split]
    kh = jnp.stack(jnp.split(k, num_heads, axis=1), axis=0)      # [h, T_k, split]
    vh = jnp.stack(jnp.split(v, num_heads, axis=1), axis=0)      # [h, T_k, split]

    scores = jnp.einsum("hns,hts->hnt", qh, kh) / (d_k ** 0.5)   # [h, N, T_k]
    scores = jax.nn.softmax(scores, axis=-1)
    out_soft = jnp.einsum("hnt,hts->hns", scores, vh)            # [h, N, split]
    out_soft = jnp.concatenate(jnp.split(out_soft, num_heads, axis=0), axis=2)[0]
    out_hard = jnp.einsum("nt,hts->hns", onehot, vh)
    out_hard = jnp.concatenate(jnp.split(out_hard, num_heads, axis=0), axis=2)[0]
    return out_hard, out_soft, scores


if __name__ == "__main__":
    # Small, ETL-consistent shapes: E=32, num_heads=4 -> d_q=16, d_k=8; 8 tokens.
    E = 32
    num_heads = 4
    token_num = 8     # TODO(synk): token_num comes from emotions.json in PyTorch; constant here.
    d_q = E // 2
    d_k = E // num_heads

    key = jax.random.PRNGKey(0)
    k_emb, k_q, k_k, k_v = jax.random.split(key, 4)
    params = {
        # nn.init.normal_(embed, mean=0, std=0.5)
        "embed": 0.5 * jax.random.normal(k_emb, (token_num, d_k), dtype=jnp.float32),
        # Linear weights stored [in, out]; deterministic synthetic init.
        "wq": 0.1 * jax.random.normal(k_q, (d_q, E), dtype=jnp.float32),
        "wk": 0.1 * jax.random.normal(k_k, (d_k, E), dtype=jnp.float32),
        "wv": 0.1 * jax.random.normal(k_v, (d_k, E), dtype=jnp.float32),
    }

    # N=2 exercises the single full-batch block; N=48 exercises the multi-step
    # (two TensorCore-shardable) grid path with tm=24.
    for N in (2, 48):
        k_in, k_hard = jax.random.split(jax.random.PRNGKey(N), 2)
        inputs = jax.random.normal(k_in, (N, d_q), dtype=jnp.float32)
        score_hard_idx = jax.random.randint(k_hard, (N,), 0, token_num)

        emb_hard, emb_soft, score_hard_oh, score_soft = jax.block_until_ready(
            etl_forward(inputs, score_hard_idx, params, num_heads=num_heads)
        )

        ref_hard, ref_soft, ref_scores = _etl_reference(
            inputs, score_hard_idx, params, num_heads=num_heads
        )
        assert emb_hard.shape == (N, 1, E)
        assert emb_soft.shape == (N, 1, E)
        assert score_hard_oh.shape == (N, token_num)
        assert score_soft.shape == (num_heads, N, 1, token_num)
        assert jnp.allclose(emb_hard[:, 0, :], ref_hard, atol=1e-5)
        assert jnp.allclose(emb_soft[:, 0, :], ref_soft, atol=1e-5)
        assert jnp.allclose(score_soft[:, :, 0, :], ref_scores, atol=1e-5)

    print("KERNEL_OK")
</pallas_src>

<mosaic_0001>
module attributes {stable_mosaic.version = 11 : i64} {
  func.func @_etl_kernel(%arg0: i32, %arg1: memref<2x16xf32, #tpu.memory_space<vmem>>, %arg2: memref<2x1xi32, #tpu.memory_space<vmem>>, %arg3: memref<16x32xf32, #tpu.memory_space<vmem>>, %arg4: memref<32x32xf32, #tpu.memory_space<vmem>>, %arg5: memref<32x32xf32, #tpu.memory_space<vmem>>, %arg6: memref<8x32xf32, #tpu.memory_space<vmem>>, %arg7: memref<32x32xf32, #tpu.memory_space<vmem>>, %arg8: memref<2x96xf32, #tpu.memory_space<vmem>>) attributes {dimension_semantics = [#tpu.dimension_semantics<parallel>], iteration_bounds = array<i64: 1>, scalar_prefetch = 0 : i64, scratch_operands = 0 : i64, tpu.core_type = #tpu.core_type<tc>, window_params = [{transform_indices = @transform_0, window_bounds = array<i64: 2, 16>}, {transform_indices = @transform_1, window_bounds = array<i64: 2, 1>}, {pipeline_mode = #tpu.pipeline_mode<synchronous>, transform_indices = @transform_2, window_bounds = array<i64: 16, 32>}, {pipeline_mode = #tpu.pipeline_mode<synchronous>, transform_indices = @transform_3, window_bounds = array<i64: 32, 32>}, {pipeline_mode = #tpu.pipeline_mode<synchronous>, transform_indices = @transform_4, window_bounds = array<i64: 32, 32>}, {pipeline_mode = #tpu.pipeline_mode<synchronous>, transform_indices = @transform_5, window_bounds = array<i64: 8, 32>}, {pipeline_mode = #tpu.pipeline_mode<synchronous>, transform_indices = @transform_6, window_bounds = array<i64: 32, 32>}, {transform_indices = @transform_7, window_bounds = array<i64: 2, 96>}]} {
    %c0 = arith.constant 0 : index
    %c0_0 = arith.constant 0 : index
    %0 = vector.load %arg1[%c0, %c0_0] : memref<2x16xf32, #tpu.memory_space<vmem>>, vector<2x16xf32>
    %c0_1 = arith.constant 0 : index
    %c0_2 = arith.constant 0 : index
    %1 = vector.load %arg3[%c0_1, %c0_2] : memref<16x32xf32, #tpu.memory_space<vmem>>, vector<16x32xf32>
    %cst = arith.constant dense<0.000000e+00> : vector<2x32xf32>
    %2 = tpu.matmul %0, %1, %cst {dimension_numbers = #tpu.dot_dimension_numbers<[1], [0], [0], [1], [0, 0, 1, 1], [], []>} : vector<2x16xf32>, vector<16x32xf32>, vector<2x32xf32> -> vector<2x32xf32>
    %c0_3 = arith.constant 0 : index
    %c0_4 = arith.constant 0 : index
    %3 = vector.load %arg4[%c0_3, %c0_4] : memref<32x32xf32, #tpu.memory_space<vmem>>, vector<32x32xf32>
    %cst_5 = arith.constant dense<0.000000e+00> : vector<2x32xf32>
    %4 = tpu.matmul %2, %3, %cst_5 {dimension_numbers = #tpu.dot_dimension_numbers<[1], [0], [0], [1], [0, 0, 1, 1], [], []>} : vector<2x32xf32>, vector<32x32xf32>, vector<2x32xf32> -> vector<2x32xf32>
    %cst_6 = arith.constant dense<0xFF800000> : vector<2xf32>
    %5 = vector.multi_reduction <maximumf>, %4, %cst_6 [1] : vector<2x32xf32> to vector<2xf32>
    %6 = vector.shape_cast %5 : vector<2xf32> to vector<2x1xf32>
    %7 = vector.broadcast %6 : vector<2x1xf32> to vector<2x32xf32>
    %8 = arith.subf %4, %7 : vector<2x32xf32>
    %9 = math.exp %8 : vector<2x32xf32>
    %c0_7 = arith.constant 0 : index
    %c0_8 = arith.constant 0 : index
    %10 = vector.load %arg7[%c0_7, %c0_8] : memref<32x32xf32, #tpu.memory_space<vmem>>, vector<32x32xf32>
    %cst_9 = arith.constant dense<0.000000e+00> : vector<2x32xf32>
    %11 = tpu.matmul %9, %10, %cst_9 {dimension_numbers = #tpu.dot_dimension_numbers<[1], [0], [0], [1], [0, 0, 1, 1], [], []>} : vector<2x32xf32>, vector<32x32xf32>, vector<2x32xf32> -> vector<2x32xf32>
    %12 = arith.divf %9, %11 : vector<2x32xf32>
    %c0_10 = arith.constant 0 : index
    %c0_11 = arith.constant 0 : index
    %13 = vector.load %arg5[%c0_10, %c0_11] : memref<32x32xf32, #tpu.memory_space<vmem>>, vector<32x32xf32>
    %cst_12 = arith.constant dense<0.000000e+00> : vector<2x32xf32>
    %14 = tpu.matmul %12, %13, %cst_12 {dimension_numbers = #tpu.dot_dimension_numbers<[1], [0], [0], [1], [0, 0, 1, 1], [], []>} : vector<2x32xf32>, vector<32x32xf32>, vector<2x32xf32> -> vector<2x32xf32>
    %15 = tpu.iota {dimensions = array<i32: 1>} : vector<2x8xi32>
    %c0_13 = arith.constant 0 : index
    %c0_14 = arith.constant 0 : index
    %16 = vector.load %arg2[%c0_13, %c0_14] : memref<2x1xi32, #tpu.memory_space<vmem>>, vector<2x1xi32>
    %17 = vector.broadcast %16 : vector<2x1xi32> to vector<2x8xi32>
    %18 = arith.cmpi eq, %15, %17 : vector<2x8xi32>
    %19 = arith.extui %18 : vector<2x8xi1> to vector<2x8xi32>
    %20 = arith.sitofp %19 : vector<2x8xi32> to vector<2x8xf32>
    %c0_15 = arith.constant 0 : index
    %c0_16 = arith.constant 0 : index
    %21 = vector.load %arg6[%c0_15, %c0_16] : memref<8x32xf32, #tpu.memory_space<vmem>>, vector<8x32xf32>
    %cst_17 = arith.constant dense<0.000000e+00> : vector<2x32xf32>
    %22 = tpu.matmul %20, %21, %cst_17 {dimension_numbers = #tpu.dot_dimension_numbers<[1], [0], [0], [1], [0, 0, 1, 1], [], []>} : vector<2x8xf32>, vector<8x32xf32>, vector<2x32xf32> -> vector<2x32xf32>
    %23 = tpu.concatenate %22, %14, %12 in 1 : vector<2x32xf32>, vector<2x32xf32>, vector<2x32xf32> -> vector<2x96xf32>
    %c0_18 = arith.constant 0 : index
    %c0_19 = arith.constant 0 : index
    %24 = vector.load %arg8[%c0_18, %c0_19] : memref<2x96xf32, #tpu.memory_space<vmem>>, vector<2x96xf32>
    tpu.vector_store %arg8[%c0_18, %c0_19], %23 {strides = array<i32>} : memref<2x96xf32, #tpu.memory_space<vmem>>, vector<2x96xf32>,
    return
  }
  func.func @transform_0(%arg0: i32) -> (i32, i32) {
    %c0_i32 = arith.constant 0 : i32
    %c0_i32_0 = arith.constant 0 : i32
    return %arg0, %c0_i32 : i32, i32
  }
  func.func @transform_1(%arg0: i32) -> (i32, i32) {
    %c0_i32 = arith.constant 0 : i32
    %c0_i32_0 = arith.constant 0 : i32
    return %arg0, %c0_i32 : i32, i32
  }
  func.func @transform_2(%arg0: i32) -> (i32, i32) {
    %c0_i32 = arith.constant 0 : i32
    %c0_i32_0 = arith.constant 0 : i32
    %c0_i32_1 = arith.constant 0 : i32
    return %c0_i32, %c0_i32_0 : i32, i32
  }
  func.func @transform_3(%arg0: i32) -> (i32, i32) {
    %c0_i32 = arith.constant 0 : i32
    %c0_i32_0 = arith.constant 0 : i32
    %c0_i32_1 = arith.constant 0 : i32
    return %c0_i32, %c0_i32_0 : i32, i32
  }
  func.func @transform_4(%arg0: i32) -> (i32, i32) {
    %c0_i32 = arith.constant 0 : i32
    %c0_i32_0 = arith.constant 0 : i32
    %c0_i32_1 = arith.constant 0 : i32
    return %c0_i32, %c0_i32_0 : i32, i32
  }
  func.func @transform_5(%arg0: i32) -> (i32, i32) {
    %c0_i32 = arith.constant 0 : i32
    %c0_i32_0 = arith.constant 0 : i32
    %c0_i32_1 = arith.constant 0 : i32
    return %c0_i32, %c0_i32_0 : i32, i32
  }
  func.func @transform_6(%arg0: i32) -> (i32, i32) {
    %c0_i32 = arith.constant 0 : i32
    %c0_i32_0 = arith.constant 0 : i32
    %c0_i32_1 = arith.constant 0 : i32
    return %c0_i32, %c0_i32_0 : i32, i32
  }
  func.func @transform_7(%arg0: i32) -> (i32, i32) {
    %c0_i32 = arith.constant 0 : i32
    %c0_i32_0 = arith.constant 0 : i32
    return %arg0, %c0_i32 : i32, i32
  }
}

</mosaic_0001>

<bundles_post_ra>
// kernel: etl_forward.1
= control target key start
LH: loop header
LB: loop body
LE: loop exit
PB: predicated region body
PF: predicated region fallthrough
CT: control target
= control target key end

     0   :  { %v525_v0 = vmov 0.0   ;;  %vm526_vm0 = vmmov 0   ;;  %vm29_vm1 = vcmask 130048   ;;  %vm107_vm2 = vcmask 261120   ;;  %s654_s2 = inlined_call_operand.vmem [shape: f32[16,32], index: 2, kind: input, shape index: {}]   ;;  %s655_s0 = inlined_call_operand.vmem [shape: f32[2,16], index: 0, kind: input, shape index: {}]   ;;  %s656_s3 = inlined_call_operand.vmem [shape: f32[32,32], index: 3, kind: input, shape index: {}]   ;;  %s657_s6 = inlined_call_operand.vmem [shape: f32[32,32], index: 6, kind: input, shape index: {}]   ;;  %s658_s1 = inlined_call_operand.vmem [shape: s32[2,1], index: 1, kind: input, shape index: {}]   ;;  %s659_s4 = inlined_call_operand.vmem [shape: f32[32,32], index: 4, kind: input, shape index: {}]   ;;  %s660_s5 = inlined_call_operand.vmem [shape: f32[8,32], index: 5, kind: input, shape index: {}]   ;;  %s661_s7 = inlined_call_operand.vmem [shape: f32[2,96], index: 7, kind: output, shape index: {}]  }
   0x1   :  { %470 = vmatprep.subr.mxu0 %v525_v0  ;;  %v28_v1 = vld [vmem:[%s654_s2 + $0x8] sm:$0xff]  ;;  %v27_v2 = vld [vmem:[%s654_s2] sm:$0xff]  ;;  %474 = vmatprep.mubr.msk.f32.mxu0 %vm526_vm0, %v525_v0  ;;  %v106_v4 = vld [vmem:[%s656_s3 + $0x18] sm:$0xff]  ;;  %vm181_vm3 = vcmask 254976   ;;  %v527_v21 = vmov 0   ;;  %v344_v28 = vlaneseq  ;;  %vm354_vm4 = vcmask 64512  }
   0x2   :  { %471 = vmatpush3.msra.mxu0 %v28_v1  ;;  %v26_v3 = vld [vmem:[%s655_s0] sm:$0x3]  ;;  %477 = vmatprep.subr.mxu1 %v525_v0  ;;  %v105_v5 = vld [vmem:[%s656_s3 + $0x10] sm:$0xff]  ;;  %v104_v6 = vld [vmem:[%s656_s3 + $0x8] sm:$0xff]  ;;  %vm436_vm6 = vcmask 523264   ;;  %vm438_vm7 = vcmask 779264  }
   0x3   :  { %472 = vmatprep.subr.mxu0 %v525_v0  ;;  %478 = vmatpush3.msra.mxu1 %v106_v4  ;;  %v103_v7 = vld [vmem:[%s656_s3] sm:$0xff]  ;;  %v191_v13 = vld [vmem:[%s657_s6 + $0x18] sm:$0xff]  ;;  %v190_v14 = vld [vmem:[%s657_s6 + $0x10] sm:$0xff]  ;;  %v345_v29 = vand.u32 127, %v344_v28 }
   0x4   :  { %473 = vmatpush3.msra.mxu0 %v27_v2  ;;  %479 = vmatprep.subr.mxu1 %v525_v0  ;;  %v189_v15 = vld [vmem:[%s657_s6 + $0x8] sm:$0xff]  ;;  %v188_v16 = vld [vmem:[%s657_s6] sm:$0xff]  ;;  %v270_v23 = vld [vmem:[%s659_s4 + $0x18] sm:$0xff] }
   0x5   :  { %475 = vmatmul.mubr.msk.f32.vlgmr.msra.gmra.mxu0 %vm29_vm1, %v26_v3  ;;  %480 = vmatpush3.msra.mxu1 %v105_v5  ;;  %v346_v22 = vld [vmem:[%s658_s1] sm:$0x3]  ;;  %v269_v24 = vld [vmem:[%s659_s4 + $0x10] sm:$0xff]  ;;  %v268_v25 = vld [vmem:[%s659_s4 + $0x8] sm:$0xff] }
   0x6   :  { %481 = vmatprep.subr.mxu1 %v525_v0  ;;  %485 = vmatprep.mubr.msk.f32.mxu1 %vm526_vm0, %v525_v0  ;;  %v267_v26 = vld [vmem:[%s659_s4] sm:$0xff]  ;;  %s528_s4 = smov 32  }
   0x7   :  { %482 = vmatpush3.msra.mxu1 %v104_v6  ;;  %488 = vmatprep.subr.mxu0 %v525_v0  ;;  %v353_v27 = vld [vmem:[%s660_s5] sm:$0xff]  ;;  %s529_s5 = smov 64  }
   0x8   :  { %483 = vmatprep.subr.mxu1 %v525_v0  ;;  %496 = vmatprep.mubr.msk.f32.mxu0 %vm526_vm0, %v525_v0 }
   0x9   :  { %484 = vmatpush3.msra.mxu1 %v103_v7  ;;  %489 = vmatpush3.msra.mxu0 %v191_v13 }
   0xa   :  { %499 = vmatprep.subr.mxu1 %v525_v0  ;;  %490 = vmatprep.subr.mxu0 %v525_v0 }
   0xb   :  { %491 = vmatpush3.msra.mxu0 %v190_v14  ;;  %520 = vset.pattern.permute.xlu0 %v527_v21 }
   0xc   :  { %492 = vmatprep.subr.mxu0 %v525_v0 }
   0xd   :  { %493 = vmatpush3.msra.mxu0 %v189_v15 }
   0xe   :  { %494 = vmatprep.subr.mxu0 %v525_v0 }
   0xf   :  { %495 = vmatpush3.msra.mxu0 %v188_v16 }
  0x10   :  { %510 = vmatprep.subr.mxu0 %v525_v0 }
  0xc5   :  { %v99_v8 = vpop.f32.mrf.mxu0 }
  0xc6   :  { %486 = vmatmul.mubr.msk.f32.vlgmr.msra.gmra.mxu1 %vm107_vm2, %v99_v8 }
  0xc7   :  { %v476_v9 = vpop.f32.mrf.mxu0  ;;  %507 = vmatprep.mubr.msk.f32.mxu1 %vm526_vm0, %v525_v0  ;;  %500 = vmatpush3.msra.mxu1 %v270_v23 }
  0xc8   :  { %501 = vmatprep.subr.mxu1 %v525_v0 }
  0xc9   :  { %502 = vmatpush3.msra.mxu1 %v269_v24 }
  0xca   :  { %503 = vmatprep.subr.mxu1 %v525_v0 }
  0xcb   :  { %504 = vmatpush3.msra.mxu1 %v268_v25 }
  0xcc   :  { %505 = vmatprep.subr.mxu1 %v525_v0 }
  0xcd   :  { %506 = vmatpush3.msra.mxu1 %v267_v26 }
 0x186   :  { %v177_v10 = vpop.f32.mrf.mxu1 }
 0x187   :  { %v182_v11 = vsel %vm181_vm3, %v177_v10, -inf }
 0x188   :  { %183 = vmax.xlane.f32.xlu0 %v182_v11  ;;  %v487_v12 = vpop.f32.mrf.mxu1 }
 0x19e   :  { %348 = vperm.xlu0 %520, %v346_v22  }
 0x211   :  { %v184_v17 = vpop.xlane.xlu0 %183 }
 0x212   :  { %v185_v18 = vsub.f32 %v177_v10, %v184_v17 }
 0x214   :  { %v186_v19 = vmul.f32 1.442695, %v185_v18 }
 0x216   :  { %521 = vpow2.f32 %v186_v19 }
 0x219   :  { %v349_v30 = vpop.permute.xlu0 %348 }
 0x21a   :  { %vm350_vm5 = vcmp.eq.s32.totalorder %v345_v29, %v349_v30 }
 0x21b   :  { %v448_v32 = vsel %vm350_vm5, 1.0, %v525_v0 }
 0x223   :  { %v522_v20 = vpop.eup %521 }
 0x224   :  { %497 = vmatmul.mubr.msk.f32.vlgmr.msra.gmra.mxu0 %vm107_vm2, %v522_v20 }
 0x225   :  { %512 = vmatprep.mubr.msk.f32.mxu0 %vm526_vm0, %v525_v0  ;;  %511 = vmatpush3.msra.mxu0 %v353_v27 }
 0x228   :  { %513 = vmatmul.mubr.msk.f32.vlgmr.msra.gmra.mxu0 %vm354_vm4, %v448_v32 }
 0x2e4   :  { %v261_v31 = vpop.f32.mrf.mxu0 }
 0x2e5   :  { %523 = vrcp.f32 %v261_v31 }
 0x2e6   :  { %v498_v33 = vpop.f32.mrf.mxu0 }
 0x2e8   :  { %v424_v36 = vpop.f32.mrf.mxu0 }
 0x2ea   :  { %v514_v37 = vpop.f32.mrf.mxu0 }
 0x2f2   :  { %v524_v34 = vpop.eup %523 }
 0x2f3   :  { %v266_v35 = vmul.f32 %v524_v34, %v522_v20 }
 0x2f5   :  { %508 = vmatmul.mubr.msk.f32.vlgmr.msra.gmra.mxu1 %vm107_vm2, %v266_v35 }
 0x3b5   :  { %v340_v38 = vpop.f32.mrf.mxu1 }
 0x3b6   :  { %429 = vrot.lane.b32.xlu1 %v340_v38, %s528_s4 }
 0x3b7   :  { %v509_v39 = vpop.f32.mrf.mxu1 }
 0x3ba   :  { %432 = vrot.lane.b32.xlu1 %v266_v35, %s529_s5 }
 0x428   :  { %v430_v40 = vpop.permute.xlu1 %429 }
 0x429   :  { %v435_v41 = vsel %vm107_vm2, %v424_v36, %v430_v40 }
 0x42c   :  { %v433_v42 = vpop.permute.xlu1 %432 }
 0x42d   :  { %v437_v43 = vsel %vm436_vm6, %v435_v41, %v433_v42 }
 0x42e   :  { %439 = vst.msk [vmem:[%s661_s7] sm:$0x3] %vm438_vm7, %v437_v43 }

</bundles_post_ra>
